<compile_context>
chip_gen: v6e
topology: v6e:2x2x1
jax: 0.10.0
libtpu: 0.0.40
codegen_flags: <defaults>
</compile_context>

<pallas_src>
import functools
import math

import jax
import jax.numpy as jnp
from jax.experimental import pallas as pl
from jax.experimental.pallas import tpu as pltpu


def _diff_attn_kernel(lam_ref, xq_ref, xk_ref, wq_ref, wkv_ref, o_ref,
                      q_scr, m_scr, l_scr, acc_scr, *, d):
    ki = pl.program_id(2)
    nk = pl.num_programs(2)
    two_d = 2 * d
    cdims = (((1,), (0,)), ((), ()))      # [m,k] @ [k,n]
    sdims = (((1,), (1,)), ((), ()))      # contract last dim of both (no .T)

    # ---- init: project the query tile once per (b, q-tile), reset accumulators ----
    @pl.when(ki == 0)
    def _init():
        xq = xq_ref[0]                                            # [tq, D_in] bf16
        q = jax.lax.dot_general(xq, wq_ref[...], cdims,
                                preferred_element_type=jnp.float32)
        q_scr[...] = q.astype(jnp.bfloat16)                       # 1/sqrt(d) already in W_q
        m_scr[...] = jnp.full(m_scr.shape, -jnp.inf, dtype=m_scr.dtype)
        l_scr[...] = jnp.zeros(l_scr.shape, dtype=l_scr.dtype)
        acc_scr[...] = jnp.zeros(acc_scr.shape, dtype=acc_scr.dtype)

    # ---- project this key/value tile: one fused MXU pass over [D_in, 4d] ----
    xk = xk_ref[0]                                                # [tk, D_in] bf16
    kv = jax.lax.dot_general(xk, wkv_ref[...], cdims,
                             preferred_element_type=jnp.float32)  # [tk, 4d] f32
    k1 = kv[:, :d].astype(jnp.bfloat16)
    k2 = kv[:, d:two_d].astype(jnp.bfloat16)
    v = kv[:, two_d:].astype(jnp.bfloat16)                        # [tk, 2d]

    q = q_scr[...]                                                # [tq, 2d] bf16
    q1, q2 = q[:, :d], q[:, d:]

    s1 = jax.lax.dot_general(q1, k1, sdims,
                             preferred_element_type=jnp.float32)  # [tq, tk]
    s2 = jax.lax.dot_general(q2, k2, sdims,
                             preferred_element_type=jnp.float32)  # [tq, tk]

    # ---- online softmax update, one pass per differential half ----
    def _update(h, s):
        m_prev = m_scr[h]                                         # [tq, 1]
        l_prev = l_scr[h]
        acc_prev = acc_scr[h]                                     # [tq, 2d]
        m_new = jnp.maximum(m_prev, jnp.max(s, axis=-1, keepdims=True))
        alpha = jnp.exp(m_prev - m_new)
        p = jnp.exp(s - m_new)                                    # [tq, tk] f32
        l_scr[h] = alpha * l_prev + jnp.sum(p, axis=-1, keepdims=True)
        pv = jax.lax.dot_general(p.astype(jnp.bfloat16), v, cdims,
                                 preferred_element_type=jnp.float32)
        acc_scr[h] = alpha * acc_prev + pv
        m_scr[h] = m_new

    _update(0, s1)
    _update(1, s2)

    # ---- finalize: normalize each half once and take the difference ----
    @pl.when(ki == nk - 1)
    def _finalize():
        lam = lam_ref[0]
        inv1 = pl.reciprocal(l_scr[0], approx=True)               # [tq, 1]
        inv2 = pl.reciprocal(l_scr[1], approx=True)
        out = acc_scr[0] * inv1 - lam * (acc_scr[1] * inv2)
        o_ref[0] = out.astype(o_ref.dtype)


def _pick_tile(n, target):
    """Largest divisor of n that is <= target and a multiple of 8 (else n)."""
    if n <= target:
        return n
    for cand in range(target, 7, -1):
        if n % cand == 0 and cand % 8 == 0:
            return cand
    return n


def diff_attn(x, w_q, w_k, w_v, lam, *, tq_target=256, tk_target=512):
    """Differential attention forward.

    x:   [B, S, D_in] float32
    w_*: [D_in, 2*d]  float32
    lam: python float or scalar
    returns [B, S, 2*d] float32
    """
    B, S, D_in = x.shape
    two_d = w_q.shape[-1]
    d = two_d // 2

    tq = _pick_tile(S, tq_target)
    tk = _pick_tile(S, tk_target)
    nq, nk = S // tq, S // tk

    # Host-side prep: fold 1/sqrt(d) into W_q, fuse W_k|W_v into one weight,
    # cast MXU operands to bf16 (accumulation inside the kernel is f32).
    scale = 1.0 / math.sqrt(d)
    x_bf = x.astype(jnp.bfloat16)
    wq_bf = (w_q.astype(jnp.float32) * scale).astype(jnp.bfloat16)
    wkv_bf = jnp.concatenate([w_k, w_v], axis=-1).astype(jnp.bfloat16)
    lam_arr = jnp.asarray([lam], dtype=jnp.float32)

    kernel = functools.partial(_diff_attn_kernel, d=d)

    flops = int(2 * B * S * D_in * two_d                  # Q projection
                + 2 * B * nq * S * D_in * 2 * two_d       # fused K|V projection
                + 4 * B * S * S * d                       # two score matmuls
                + 4 * B * S * S * two_d)                  # two P@V matmuls
    cost = pl.CostEstimate(
        flops=flops,
        transcendentals=int(2 * B * S * S),
        bytes_accessed=int(2 * x_bf.size * 2
                           + wq_bf.size * 2 + wkv_bf.size * 2
                           + B * S * two_d * 4),
    )

    return pl.pallas_call(
        kernel,
        out_shape=jax.ShapeDtypeStruct((B, S, two_d), jnp.float32),
        grid=(B, nq, nk),
        in_specs=[
            pl.BlockSpec(memory_space=pltpu.MemorySpace.SMEM),           # lambda scalar
            pl.BlockSpec((1, tq, D_in), lambda b, qi, ki: (b, qi, 0)),   # X, query tile
            pl.BlockSpec((1, tk, D_in), lambda b, qi, ki: (b, ki, 0)),   # X, key/value tile
            pl.BlockSpec((D_in, two_d), lambda b, qi, ki: (0, 0)),       # W_q (pre-scaled)
            pl.BlockSpec((D_in, 2 * two_d), lambda b, qi, ki: (0, 0)),   # [W_k | W_v]
        ],
        out_specs=pl.BlockSpec((1, tq, two_d), lambda b, qi, ki: (b, qi, 0)),
        scratch_shapes=[
            pltpu.VMEM((tq, two_d), jnp.bfloat16),       # cached scaled Q tile
            pltpu.VMEM((2, tq, 1), jnp.float32),         # running max, per half
            pltpu.VMEM((2, tq, 1), jnp.float32),         # running denom, per half
            pltpu.VMEM((2, tq, two_d), jnp.float32),     # running numerator, per half
        ],
        compiler_params=pltpu.CompilerParams(
            dimension_semantics=("parallel", "parallel", "arbitrary"),
            # 32 MiB is safe on every chip (raises v5e's 16 MiB default, matches
            # v6e/v7x defaults) and is ample for these tile sizes.
            vmem_limit_bytes=32 * 1024 * 1024,
        ),
        cost_estimate=cost,
    )(lam_arr, x_bf, x_bf, wq_bf, wkv_bf)


def diff_attn_ref(x, w_q, w_k, w_v, lam, cast_dtype=jnp.float32):
    """Pure-JAX reference mirroring the PyTorch module.

    cast_dtype lets us mimic the kernel's bf16 MXU operands for tight checks.
    """
    cast = lambda a: a.astype(cast_dtype).astype(jnp.float32)
    x, w_q, w_k, w_v = cast(x), cast(w_q), cast(w_k), cast(w_v)
    d = w_q.shape[-1] // 2
    q = x @ w_q
    k = x @ w_k
    v = x @ w_v
    q1, q2 = q[..., :d], q[..., d:]
    k1, k2 = k[..., :d], k[..., d:]
    s = 1.0 / math.sqrt(d)
    a1 = jnp.einsum("bqd,bkd->bqk", q1, k1) * s
    a2 = jnp.einsum("bqd,bkd->bqk", q2, k2) * s
    p1 = jax.nn.softmax(a1, axis=-1)
    p2 = jax.nn.softmax(a2, axis=-1)
    return (p1 - lam * p2) @ v


if __name__ == "__main__":
    # Small shapes consistent with the module's forward:
    # batch=2, seq_len=8, input_dim=32, d=16 (so 2*d = 32).
    B, S, D_in, d = 2, 8, 32, 16
    lam = 0.5

    key = jax.random.PRNGKey(0)
    kx, kq, kk, kv = jax.random.split(key, 4)
    # 1/sqrt(D_in)-scaled weights keep activations/logits O(1), so the bf16-MXU
    # kernel can be checked against the f32 reference meaningfully.
    w_scale = 1.0 / math.sqrt(D_in)
    x = jax.random.normal(kx, (B, S, D_in), dtype=jnp.float32)
    w_q = jax.random.normal(kq, (D_in, 2 * d), dtype=jnp.float32) * w_scale
    w_k = jax.random.normal(kk, (D_in, 2 * d), dtype=jnp.float32) * w_scale
    w_v = jax.random.normal(kv, (D_in, 2 * d), dtype=jnp.float32) * w_scale

    out = jax.block_until_ready(diff_attn(x, w_q, w_k, w_v, lam))
    assert out.shape == (B, S, 2 * d)

    # Tight-ish check vs a reference that rounds the MXU operands to bf16 like the
    # kernel does, plus a looser sanity check vs the pure-f32 reference.
    ref_bf16 = diff_attn_ref(x, w_q, w_k, w_v, lam, cast_dtype=jnp.bfloat16)
    ref_f32 = diff_attn_ref(x, w_q, w_k, w_v, lam)
    err_bf16 = float(jnp.max(jnp.abs(out - ref_bf16)))
    err_f32 = float(jnp.max(jnp.abs(out - ref_f32)))
    assert jnp.allclose(out, ref_bf16, atol=5e-2, rtol=5e-2), (
        f"mismatch vs bf16-matched reference, max abs err {err_bf16:.4e}")
    assert jnp.allclose(out, ref_f32, atol=1.5e-1, rtol=1.5e-1), (
        f"mismatch vs f32 reference, max abs err {err_f32:.4e}")

    print("KERNEL_OK")
</pallas_src>

<mosaic_0001>
module attributes {stable_mosaic.version = 11 : i64} {
  func.func @_diff_attn_kernel(%arg0: i32, %arg1: i32, %arg2: i32, %arg3: memref<1xf32, #tpu.memory_space<smem>>, %arg4: memref<1x8x32xbf16, #tpu.memory_space<vmem>>, %arg5: memref<1x8x32xbf16, #tpu.memory_space<vmem>>, %arg6: memref<32x32xbf16, #tpu.memory_space<vmem>>, %arg7: memref<32x64xbf16, #tpu.memory_space<vmem>>, %arg8: memref<1x8x32xf32, #tpu.memory_space<vmem>>, %arg9: memref<8x32xbf16, #tpu.memory_space<vmem>>, %arg10: memref<2x8x1xf32, #tpu.memory_space<vmem>>, %arg11: memref<2x8x1xf32, #tpu.memory_space<vmem>>, %arg12: memref<2x8x32xf32, #tpu.memory_space<vmem>>) attributes {dimension_semantics = [#tpu.dimension_semantics<parallel>, #tpu.dimension_semantics<parallel>, #tpu.dimension_semantics<arbitrary>], iteration_bounds = array<i64: 2, 1, 1>, scalar_prefetch = 0 : i64, scratch_operands = 4 : i64, tpu.core_type = #tpu.core_type<tc>, window_params = [{transform_indices = @transform_0, window_bounds = array<i64: 1>}, {transform_indices = @transform_1, window_bounds = array<i64: 1, 8, 32>}, {transform_indices = @transform_2, window_bounds = array<i64: 1, 8, 32>}, {pipeline_mode = #tpu.pipeline_mode<synchronous>, transform_indices = @transform_3, window_bounds = array<i64: 32, 32>}, {pipeline_mode = #tpu.pipeline_mode<synchronous>, transform_indices = @transform_4, window_bounds = array<i64: 32, 64>}, {transform_indices = @transform_5, window_bounds = array<i64: 1, 8, 32>}]} {
    %c0_i32 = arith.constant 0 : i32
    %0 = arith.cmpi eq, %arg2, %c0_i32 : i32
    %1 = arith.extui %0 : i1 to i32
    %c0_i32_0 = arith.constant 0 : i32
    %2 = arith.cmpi ne, %1, %c0_i32_0 : i32
    scf.if %2 {
      %c0_52 = arith.constant 0 : index
      %c0_53 = arith.constant 0 : index
      %c0_54 = arith.constant 0 : index
      %85 = vector.load %arg4[%c0_52, %c0_53, %c0_54] : memref<1x8x32xbf16, #tpu.memory_space<vmem>>, vector<1x8x32xbf16>
      %86 = vector.shape_cast %85 : vector<1x8x32xbf16> to vector<8x32xbf16>
      %c0_55 = arith.constant 0 : index
      %c0_56 = arith.constant 0 : index
      %87 = vector.load %arg6[%c0_55, %c0_56] : memref<32x32xbf16, #tpu.memory_space<vmem>>, vector<32x32xbf16>
      %cst_57 = arith.constant dense<0.000000e+00> : vector<8x32xf32>
      %88 = tpu.matmul %86, %87, %cst_57 {dimension_numbers = #tpu.dot_dimension_numbers<[1], [0], [0], [1], [0, 0, 1, 1], [], []>} : vector<8x32xbf16>, vector<32x32xbf16>, vector<8x32xf32> -> vector<8x32xf32>
      %89 = arith.truncf %88 : vector<8x32xf32> to vector<8x32xbf16>
      %c0_58 = arith.constant 0 : index
      %c0_59 = arith.constant 0 : index
      %90 = vector.load %arg9[%c0_58, %c0_59] : memref<8x32xbf16, #tpu.memory_space<vmem>>, vector<8x32xbf16>
      tpu.vector_store %arg9[%c0_58, %c0_59], %89 {strides = array<i32>} : memref<8x32xbf16, #tpu.memory_space<vmem>>, vector<8x32xbf16>,
      %cst_60 = arith.constant 0xFF800000 : f32
      %91 = vector.broadcast %cst_60 : f32 to vector<2x8x1xf32>
      %c0_61 = arith.constant 0 : index
      %c0_62 = arith.constant 0 : index
      %c0_63 = arith.constant 0 : index
      %92 = vector.load %arg10[%c0_61, %c0_62, %c0_63] : memref<2x8x1xf32, #tpu.memory_space<vmem>>, vector<2x8x1xf32>
      tpu.vector_store %arg10[%c0_61, %c0_62, %c0_63], %91 {strides = array<i32>} : memref<2x8x1xf32, #tpu.memory_space<vmem>>, vector<2x8x1xf32>,
      %cst_64 = arith.constant 0.000000e+00 : f32
      %93 = vector.broadcast %cst_64 : f32 to vector<2x8x1xf32>
      %c0_65 = arith.constant 0 : index
      %c0_66 = arith.constant 0 : index
      %c0_67 = arith.constant 0 : index
      %94 = vector.load %arg11[%c0_65, %c0_66, %c0_67] : memref<2x8x1xf32, #tpu.memory_space<vmem>>, vector<2x8x1xf32>
      tpu.vector_store %arg11[%c0_65, %c0_66, %c0_67], %93 {strides = array<i32>} : memref<2x8x1xf32, #tpu.memory_space<vmem>>, vector<2x8x1xf32>,
      %cst_68 = arith.constant 0.000000e+00 : f32
      %95 = vector.broadcast %cst_68 : f32 to vector<2x8x32xf32>
      %c0_69 = arith.constant 0 : index
      %c0_70 = arith.constant 0 : index
      %c0_71 = arith.constant 0 : index
      %96 = vector.load %arg12[%c0_69, %c0_70, %c0_71] : memref<2x8x32xf32, #tpu.memory_space<vmem>>, vector<2x8x32xf32>
      tpu.vector_store %arg12[%c0_69, %c0_70, %c0_71], %95 {strides = array<i32>} : memref<2x8x32xf32, #tpu.memory_space<vmem>>, vector<2x8x32xf32>,
    } else {
    }
    %c0 = arith.constant 0 : index
    %c0_1 = arith.constant 0 : index
    %c0_2 = arith.constant 0 : index
    %3 = vector.load %arg5[%c0, %c0_1, %c0_2] : memref<1x8x32xbf16, #tpu.memory_space<vmem>>, vector<1x8x32xbf16>
    %4 = vector.shape_cast %3 : vector<1x8x32xbf16> to vector<8x32xbf16>
    %c0_3 = arith.constant 0 : index
    %c0_4 = arith.constant 0 : index
    %5 = vector.load %arg7[%c0_3, %c0_4] : memref<32x64xbf16, #tpu.memory_space<vmem>>, vector<32x64xbf16>
    %cst = arith.constant dense<0.000000e+00> : vector<8x64xf32>
    %6 = tpu.matmul %4, %5, %cst {dimension_numbers = #tpu.dot_dimension_numbers<[1], [0], [0], [1], [0, 0, 1, 1], [], []>} : vector<8x32xbf16>, vector<32x64xbf16>, vector<8x64xf32> -> vector<8x64xf32>
    %7 = vector.extract_strided_slice %6 {offsets = [0, 0], sizes = [8, 16], strides = [1, 1]} : vector<8x64xf32> to vector<8x16xf32>
    %8 = arith.truncf %7 : vector<8x16xf32> to vector<8x16xbf16>
    %9 = vector.extract_strided_slice %6 {offsets = [0, 16], sizes = [8, 16], strides = [1, 1]} : vector<8x64xf32> to vector<8x16xf32>
    %10 = arith.truncf %9 : vector<8x16xf32> to vector<8x16xbf16>
    %11 = vector.extract_strided_slice %6 {offsets = [0, 32], sizes = [8, 32], strides = [1, 1]} : vector<8x64xf32> to vector<8x32xf32>
    %12 = arith.truncf %11 : vector<8x32xf32> to vector<8x32xbf16>
    %c0_5 = arith.constant 0 : index
    %c0_6 = arith.constant 0 : index
    %13 = vector.load %arg9[%c0_5, %c0_6] : memref<8x32xbf16, #tpu.memory_space<vmem>>, vector<8x32xbf16>
    %14 = vector.extract_strided_slice %13 {offsets = [0, 0], sizes = [8, 16], strides = [1, 1]} : vector<8x32xbf16> to vector<8x16xbf16>
    %15 = vector.extract_strided_slice %13 {offsets = [0, 16], sizes = [8, 16], strides = [1, 1]} : vector<8x32xbf16> to vector<8x16xbf16>
    %cst_7 = arith.constant dense<0.000000e+00> : vector<8x8xf32>
    %16 = tpu.matmul %14, %8, %cst_7 {dimension_numbers = #tpu.dot_dimension_numbers<[1], [1], [0], [0], [0, 0, 1, 0], [], []>} : vector<8x16xbf16>, vector<8x16xbf16>, vector<8x8xf32> -> vector<8x8xf32>
    %cst_8 = arith.constant dense<0.000000e+00> : vector<8x8xf32>
    %17 = tpu.matmul %15, %10, %cst_8 {dimension_numbers = #tpu.dot_dimension_numbers<[1], [1], [0], [0], [0, 0, 1, 0], [], []>} : vector<8x16xbf16>, vector<8x16xbf16>, vector<8x8xf32> -> vector<8x8xf32>
    %c0_9 = arith.constant 0 : index
    %c0_10 = arith.constant 0 : index
    %c0_11 = arith.constant 0 : index
    %18 = vector.load %arg10[%c0_9, %c0_10, %c0_11] : memref<2x8x1xf32, #tpu.memory_space<vmem>>, vector<1x8x1xf32>
    %19 = vector.shape_cast %18 : vector<1x8x1xf32> to vector<8x1xf32>
    %c0_12 = arith.constant 0 : index
    %c0_13 = arith.constant 0 : index
    %c0_14 = arith.constant 0 : index
    %20 = vector.load %arg11[%c0_12, %c0_13, %c0_14] : memref<2x8x1xf32, #tpu.memory_space<vmem>>, vector<1x8x1xf32>
    %21 = vector.shape_cast %20 : vector<1x8x1xf32> to vector<8x1xf32>
    %c0_15 = arith.constant 0 : index
    %c0_16 = arith.constant 0 : index
    %c0_17 = arith.constant 0 : index
    %22 = vector.load %arg12[%c0_15, %c0_16, %c0_17] : memref<2x8x32xf32, #tpu.memory_space<vmem>>, vector<1x8x32xf32>
    %23 = vector.shape_cast %22 : vector<1x8x32xf32> to vector<8x32xf32>
    %cst_18 = arith.constant dense<0xFF800000> : vector<8xf32>
    %24 = vector.multi_reduction <maximumf>, %16, %cst_18 [1] : vector<8x8xf32> to vector<8xf32>
    %25 = vector.shape_cast %24 : vector<8xf32> to vector<8x1xf32>
    %26 = arith.maximumf %19, %25 : vector<8x1xf32>
    %27 = arith.subf %19, %26 : vector<8x1xf32>
    %28 = math.exp %27 : vector<8x1xf32>
    %29 = vector.broadcast %26 : vector<8x1xf32> to vector<8x8xf32>
    %30 = arith.subf %16, %29 : vector<8x8xf32>
    %31 = math.exp %30 : vector<8x8xf32>
    %32 = arith.mulf %28, %21 : vector<8x1xf32>
    %cst_19 = arith.constant dense<0.000000e+00> : vector<8xf32>
    %33 = vector.multi_reduction <add>, %31, %cst_19 [1] : vector<8x8xf32> to vector<8xf32>
    %34 = vector.shape_cast %33 : vector<8xf32> to vector<8x1xf32>
    %35 = arith.addf %32, %34 : vector<8x1xf32>
    %c0_20 = arith.constant 0 : index
    %c0_21 = arith.constant 0 : index
    %c0_22 = arith.constant 0 : index
    %36 = vector.load %arg11[%c0_20, %c0_21, %c0_22] : memref<2x8x1xf32, #tpu.memory_space<vmem>>, vector<1x8x1xf32>
    %37 = vector.shape_cast %36 : vector<1x8x1xf32> to vector<8x1xf32>
    %38 = vector.shape_cast %35 : vector<8x1xf32> to vector<1x8x1xf32>
    tpu.vector_store %arg11[%c0_20, %c0_21, %c0_22], %38 {strides = array<i32>} : memref<2x8x1xf32, #tpu.memory_space<vmem>>, vector<1x8x1xf32>,
    %39 = arith.truncf %31 : vector<8x8xf32> to vector<8x8xbf16>
    %cst_23 = arith.constant dense<0.000000e+00> : vector<8x32xf32>
    %40 = tpu.matmul %39, %12, %cst_23 {dimension_numbers = #tpu.dot_dimension_numbers<[1], [0], [0], [1], [0, 0, 1, 1], [], []>} : vector<8x8xbf16>, vector<8x32xbf16>, vector<8x32xf32> -> vector<8x32xf32>
    %41 = vector.broadcast %28 : vector<8x1xf32> to vector<8x32xf32>
    %42 = arith.mulf %41, %23 : vector<8x32xf32>
    %43 = arith.addf %42, %40 : vector<8x32xf32>
    %c0_24 = arith.constant 0 : index
    %c0_25 = arith.constant 0 : index
    %c0_26 = arith.constant 0 : index
    %44 = vector.load %arg12[%c0_24, %c0_25, %c0_26] : memref<2x8x32xf32, #tpu.memory_space<vmem>>, vector<1x8x32xf32>
    %45 = vector.shape_cast %44 : vector<1x8x32xf32> to vector<8x32xf32>
    %46 = vector.shape_cast %43 : vector<8x32xf32> to vector<1x8x32xf32>
    tpu.vector_store %arg12[%c0_24, %c0_25, %c0_26], %46 {strides = array<i32>} : memref<2x8x32xf32, #tpu.memory_space<vmem>>, vector<1x8x32xf32>,
    %c0_27 = arith.constant 0 : index
    %c0_28 = arith.constant 0 : index
    %c0_29 = arith.constant 0 : index
    %47 = vector.load %arg10[%c0_27, %c0_28, %c0_29] : memref<2x8x1xf32, #tpu.memory_space<vmem>>, vector<1x8x1xf32>
    %48 = vector.shape_cast %47 : vector<1x8x1xf32> to vector<8x1xf32>
    %49 = vector.shape_cast %26 : vector<8x1xf32> to vector<1x8x1xf32>
    tpu.vector_store %arg10[%c0_27, %c0_28, %c0_29], %49 {strides = array<i32>} : memref<2x8x1xf32, #tpu.memory_space<vmem>>, vector<1x8x1xf32>,
    %c1 = arith.constant 1 : index
    %c0_30 = arith.constant 0 : index
    %c0_31 = arith.constant 0 : index
    %50 = vector.load %arg10[%c1, %c0_30, %c0_31] : memref<2x8x1xf32, #tpu.memory_space<vmem>>, vector<1x8x1xf32>
    %51 = vector.shape_cast %50 : vector<1x8x1xf32> to vector<8x1xf32>
    %c1_32 = arith.constant 1 : index
    %c0_33 = arith.constant 0 : index
    %c0_34 = arith.constant 0 : index
    %52 = vector.load %arg11[%c1_32, %c0_33, %c0_34] : memref<2x8x1xf32, #tpu.memory_space<vmem>>, vector<1x8x1xf32>
    %53 = vector.shape_cast %52 : vector<1x8x1xf32> to vector<8x1xf32>
    %c1_35 = arith.constant 1 : index
    %c0_36 = arith.constant 0 : index
    %c0_37 = arith.constant 0 : index
    %54 = vector.load %arg12[%c1_35, %c0_36, %c0_37] : memref<2x8x32xf32, #tpu.memory_space<vmem>>, vector<1x8x32xf32>
    %55 = vector.shape_cast %54 : vector<1x8x32xf32> to vector<8x32xf32>
    %cst_38 = arith.constant dense<0xFF800000> : vector<8xf32>
    %56 = vector.multi_reduction <maximumf>, %17, %cst_38 [1] : vector<8x8xf32> to vector<8xf32>
    %57 = vector.shape_cast %56 : vector<8xf32> to vector<8x1xf32>
    %58 = arith.maximumf %51, %57 : vector<8x1xf32>
    %59 = arith.subf %51, %58 : vector<8x1xf32>
    %60 = math.exp %59 : vector<8x1xf32>
    %61 = vector.broadcast %58 : vector<8x1xf32> to vector<8x8xf32>
    %62 = arith.subf %17, %61 : vector<8x8xf32>
    %63 = math.exp %62 : vector<8x8xf32>
    %64 = arith.mulf %60, %53 : vector<8x1xf32>
    %cst_39 = arith.constant dense<0.000000e+00> : vector<8xf32>
    %65 = vector.multi_reduction <add>, %63, %cst_39 [1] : vector<8x8xf32> to vector<8xf32>
    %66 = vector.shape_cast %65 : vector<8xf32> to vector<8x1xf32>
    %67 = arith.addf %64, %66 : vector<8x1xf32>
    %c1_40 = arith.constant 1 : index
    %c0_41 = arith.constant 0 : index
    %c0_42 = arith.constant 0 : index
    %68 = vector.load %arg11[%c1_40, %c0_41, %c0_42] : memref<2x8x1xf32, #tpu.memory_space<vmem>>, vector<1x8x1xf32>
    %69 = vector.shape_cast %68 : vector<1x8x1xf32> to vector<8x1xf32>
    %70 = vector.shape_cast %67 : vector<8x1xf32> to vector<1x8x1xf32>
    tpu.vector_store %arg11[%c1_40, %c0_41, %c0_42], %70 {strides = array<i32>} : memref<2x8x1xf32, #tpu.memory_space<vmem>>, vector<1x8x1xf32>,
    %71 = arith.truncf %63 : vector<8x8xf32> to vector<8x8xbf16>
    %cst_43 = arith.constant dense<0.000000e+00> : vector<8x32xf32>
    %72 = tpu.matmul %71, %12, %cst_43 {dimension_numbers = #tpu.dot_dimension_numbers<[1], [0], [0], [1], [0, 0, 1, 1], [], []>} : vector<8x8xbf16>, vector<8x32xbf16>, vector<8x32xf32> -> vector<8x32xf32>
    %73 = vector.broadcast %60 : vector<8x1xf32> to vector<8x32xf32>
    %74 = arith.mulf %73, %55 : vector<8x32xf32>
    %75 = arith.addf %74, %72 : vector<8x32xf32>
    %c1_44 = arith.constant 1 : index
    %c0_45 = arith.constant 0 : index
    %c0_46 = arith.constant 0 : index
    %76 = vector.load %arg12[%c1_44, %c0_45, %c0_46] : memref<2x8x32xf32, #tpu.memory_space<vmem>>, vector<1x8x32xf32>
    %77 = vector.shape_cast %76 : vector<1x8x32xf32> to vector<8x32xf32>
    %78 = vector.shape_cast %75 : vector<8x32xf32> to vector<1x8x32xf32>
    tpu.vector_store %arg12[%c1_44, %c0_45, %c0_46], %78 {strides = array<i32>} : memref<2x8x32xf32, #tpu.memory_space<vmem>>, vector<1x8x32xf32>,
    %c1_47 = arith.constant 1 : index
    %c0_48 = arith.constant 0 : index
    %c0_49 = arith.constant 0 : index
    %79 = vector.load %arg10[%c1_47, %c0_48, %c0_49] : memref<2x8x1xf32, #tpu.memory_space<vmem>>, vector<1x8x1xf32>
    %80 = vector.shape_cast %79 : vector<1x8x1xf32> to vector<8x1xf32>
    %81 = vector.shape_cast %58 : vector<8x1xf32> to vector<1x8x1xf32>
    tpu.vector_store %arg10[%c1_47, %c0_48, %c0_49], %81 {strides = array<i32>} : memref<2x8x1xf32, #tpu.memory_space<vmem>>, vector<1x8x1xf32>,
    %c0_i32_50 = arith.constant 0 : i32
    %82 = arith.cmpi eq, %arg2, %c0_i32_50 : i32
    %83 = arith.extui %82 : i1 to i32
    %c0_i32_51 = arith.constant 0 : i32
    %84 = arith.cmpi ne, %83, %c0_i32_51 : i32
    scf.if %84 {
      %c0_52 = arith.constant 0 : index
      %85 = memref.load %arg3[%c0_52] : memref<1xf32, #tpu.memory_space<smem>>
      %c0_53 = arith.constant 0 : index
      %c0_54 = arith.constant 0 : index
      %c0_55 = arith.constant 0 : index
      %86 = vector.load %arg11[%c0_53, %c0_54, %c0_55] : memref<2x8x1xf32, #tpu.memory_space<vmem>>, vector<1x8x1xf32>
      %87 = vector.shape_cast %86 : vector<1x8x1xf32> to vector<8x1xf32>
      %88 = tpu.reciprocal %87 {approx = true} : vector<8x1xf32> -> vector<8x1xf32>
      %c1_56 = arith.constant 1 : index
      %c0_57 = arith.constant 0 : index
      %c0_58 = arith.constant 0 : index
      %89 = vector.load %arg11[%c1_56, %c0_57, %c0_58] : memref<2x8x1xf32, #tpu.memory_space<vmem>>, vector<1x8x1xf32>
      %90 = vector.shape_cast %89 : vector<1x8x1xf32> to vector<8x1xf32>
      %91 = tpu.reciprocal %90 {approx = true} : vector<8x1xf32> -> vector<8x1xf32>
      %c0_59 = arith.constant 0 : index
      %c0_60 = arith.constant 0 : index
      %c0_61 = arith.constant 0 : index
      %92 = vector.load %arg12[%c0_59, %c0_60, %c0_61] : memref<2x8x32xf32, #tpu.memory_space<vmem>>, vector<1x8x32xf32>
      %93 = vector.shape_cast %92 : vector<1x8x32xf32> to vector<8x32xf32>
      %94 = vector.broadcast %88 : vector<8x1xf32> to vector<8x32xf32>
      %95 = arith.mulf %93, %94 : vector<8x32xf32>
      %c1_62 = arith.constant 1 : index
      %c0_63 = arith.constant 0 : index
      %c0_64 = arith.constant 0 : index
      %96 = vector.load %arg12[%c1_62, %c0_63, %c0_64] : memref<2x8x32xf32, #tpu.memory_space<vmem>>, vector<1x8x32xf32>
      %97 = vector.shape_cast %96 : vector<1x8x32xf32> to vector<8x32xf32>
      %98 = vector.broadcast %91 : vector<8x1xf32> to vector<8x32xf32>
      %99 = arith.mulf %97, %98 : vector<8x32xf32>
      %100 = vector.broadcast %85 : f32 to vector<8x32xf32>
      %101 = arith.mulf %100, %99 : vector<8x32xf32>
      %102 = arith.subf %95, %101 : vector<8x32xf32>
      %c0_65 = arith.constant 0 : index
      %c0_66 = arith.constant 0 : index
      %c0_67 = arith.constant 0 : index
      %103 = vector.load %arg8[%c0_65, %c0_66, %c0_67] : memref<1x8x32xf32, #tpu.memory_space<vmem>>, vector<1x8x32xf32>
      %104 = vector.shape_cast %103 : vector<1x8x32xf32> to vector<8x32xf32>
      %105 = vector.shape_cast %102 : vector<8x32xf32> to vector<1x8x32xf32>
      tpu.vector_store %arg8[%c0_65, %c0_66, %c0_67], %105 {strides = array<i32>} : memref<1x8x32xf32, #tpu.memory_space<vmem>>, vector<1x8x32xf32>,
    } else {
    }
    return
  }
  func.func @transform_0(%arg0: i32, %arg1: i32, %arg2: i32) -> i32 {
    %c0_i32 = arith.constant 0 : i32
    %c0_i32_0 = arith.constant 0 : i32
    return %c0_i32 : i32
  }
  func.func @transform_1(%arg0: i32, %arg1: i32, %arg2: i32) -> (i32, i32, i32) {
    %c0_i32 = arith.constant 0 : i32
    %c0_i32_0 = arith.constant 0 : i32
    return %arg0, %arg1, %c0_i32 : i32, i32, i32
  }
  func.func @transform_2(%arg0: i32, %arg1: i32, %arg2: i32) -> (i32, i32, i32) {
    %c0_i32 = arith.constant 0 : i32
    %c0_i32_0 = arith.constant 0 : i32
    return %arg0, %arg2, %c0_i32 : i32, i32, i32
  }
  func.func @transform_3(%arg0: i32, %arg1: i32, %arg2: i32) -> (i32, i32) {
    %c0_i32 = arith.constant 0 : i32
    %c0_i32_0 = arith.constant 0 : i32
    %c0_i32_1 = arith.constant 0 : i32
    return %c0_i32, %c0_i32_0 : i32, i32
  }
  func.func @transform_4(%arg0: i32, %arg1: i32, %arg2: i32) -> (i32, i32) {
    %c0_i32 = arith.constant 0 : i32
    %c0_i32_0 = arith.constant 0 : i32
    %c0_i32_1 = arith.constant 0 : i32
    return %c0_i32, %c0_i32_0 : i32, i32
  }
  func.func @transform_5(%arg0: i32, %arg1: i32, %arg2: i32) -> (i32, i32, i32) {
    %c0_i32 = arith.constant 0 : i32
    %c0_i32_0 = arith.constant 0 : i32
    return %arg0, %arg1, %c0_i32 : i32, i32, i32
  }
}

</mosaic_0001>

<bundles_post_ra>
// kernel: tpu_custom_call.1
= control target key start
LH: loop header
LB: loop body
LE: loop exit
PB: predicated region body
PF: predicated region fallthrough
CT: control target
= control target key end

     0   :  { %s1580_s0 = inlined_call_operand.<no memory space> [shape: f32[1], index: 0, kind: input, shape index: {}]   ;;  %s1581_s1 = inlined_call_operand.hbm [shape: bf16[2,8,32], index: 1, kind: input, shape index: {}]   ;;  %s1582_s2 = inlined_call_operand.hbm [shape: bf16[2,8,32], index: 2, kind: input, shape index: {}]   ;;  %s1583_s3 = inlined_call_operand.hbm [shape: bf16[32,32], index: 3, kind: input, shape index: {}]   ;;  %s1584_s4 = inlined_call_operand.hbm [shape: bf16[32,64], index: 4, kind: input, shape index: {}]   ;;  %s1585_s5 = inlined_call_operand.hbm [shape: f32[2,8,32], index: 5, kind: output, shape index: {}]  }
   0x1   :  { %1587 = sst [smem:[#allocation21_spill]] %s1581_s1 }
   0x2   :  { %1588 = sst [smem:[#allocation22_spill]] %s1582_s2 }
   0x3   :  { %10 = sst [smem:[#allocation6]] %s1580_s0 }
   0x4   :  { %11 = vsyncpa [#allocation8], 0 }
   0x5   :  { %13 = vsyncpa [#allocation8 + $0x1], 0 }
   0x6   :  { %14 = vsyncpa [#allocation11], 0 }
   0x7   :  { %16 = vsyncpa [#allocation11 + $0x1], 0 }
   0x8   :  { %17 = vsyncpa [#allocation14], 0 }
   0x9   :  { %18 = vsyncpa [#allocation9], 0 }
   0xa   :  { %20 = vsyncpa [#allocation9 + $0x1], 0  ;;  %s1354_s20 = smov 0   ;;  %s1356_s21 = smov 0  }
   0xb   :  { %s1358_s22 = smov 0   ;;  %s1360_s23 = smov 0  }
   0xc   :  { %s1362_s24 = smov 0   ;;  %s1364_s25 = smov 0  }
   0xd LB: > { %s1385_s0 = sadd.s32 4294967295, %s1306_s25   ;;  %s907_s26 = sadd.s32 4294967294, %s1306_s25   ;;  %s1306_s25 = sphi %s1364_s25, %s26_s25   ;;  %s1302_s24 = sphi %s1362_s24, %s1608_s24   ;;  %s1298_s23 = sphi %s1360_s23, %s1607_s23   ;;  %s1294_s22 = sphi %s1358_s22, %s1606_s22   ;;  %s1290_s21 = sphi %s1356_s21, %s1605_s21   ;;  %s1286_s20 = sphi %s1354_s20, %s1604_s20  }
   0xe   : > { %p88_p0 = scmp.ne.s32.totalorder %s1290_s21, %s1286_s20  ;;  %p1586_p1 = scmp.eq.s32.totalorder %s1385_s0, 0 }
   0xf   : > { %p190_p3 = scmp.eq.s32.totalorder %s907_s26, 1  ;;  %p908_p5 = scmp.ge.s32.totalorder %s1306_s25, 1 }
  0x10   : > { %p1394_p4 = por %p1586_p1, %p88_p0  ;;  %p197_p7 = scmp.lt.s32.totalorder %s1306_s25, 3 }
  0x11   : > { %p1399_p6 = por %p190_p3, %p88_p0  ;;  %s1308_s30 = smov [#allocation12]  }
  0x12   : > { %p1404_p8 = pnand %p908_p5, %p197_p7  ;;  %s212_s6 = sshll.u32 %s1308_s30, 4  ;;  %s213_s6 = int_to_ptr.vmem [resolvable:$true] %s212_s6 }
  0x13   : > { %s1590_s28 = scalar_select %p1399_p6, 1, 0 }
  0x14   : > { %p1005_p9 = pneg %p1404_p8  ;;  %s1309_s8 = smov [#allocation13]  }
  0x15   : > { %s225_s9 = sshll.u32 %s1309_s8, 4  ;;  %s1117_s10 = scalar_lea.vmem %s213_s6, 256  ;;  %s226_s9 = int_to_ptr.vmem [resolvable:$true] %s225_s9 }
  0x16   : > { %p1413_p11 = pnand %p1005_p9, %p1586_p1  ;;  %p1118_p13 = scmp.ne.s32.totalorder %s213_s6, %s1117_s10 }
  0x17   : > { %p1125_p5 = scmp.lt.s32.totalorder %s213_s6, %s213_s6  ;;  %p1126_p7 = scmp.lt.s32.totalorder %s1117_s10, %s1117_s10 }
  0x18   : > { %p1108_p12 = pneg %p1413_p11 }
  0x19   : > { %p1127_p10 = por %p1126_p7, %p1125_p5 }
  0x1a   : > { %p1120_p0 = pnand %p1118_p13, %p1108_p12 }
  0x1c   : > { %p1121_p3 = pneg %p1120_p0 }
  0x1e   : > { %p1128_p9 = pnand %p1127_p10, %p1121_p3 }
  0x20   : > { %1131 = shalt.err (!%p1128_p9)
}
  0x21   : > { %s1310_s11 = smov 64   ;;  %s1311_s12 = smov 4  }
  0x22   : > { %1008 = dma.hbm_to_vmem [thread:$0]  (!%p1413_p11), %s1583_s3, 256, %s213_s6, [#allocation11], %s1310_s11, %s1310_s11, %s1311_s12  }
  0x23   : > { %s1143_s15 = scalar_lea.vmem %s226_s9, 256  ;;  %p1151_p2 = scmp.lt.s32.totalorder %s226_s9, %s226_s9 }
  0x24   : > { %p1144_p1 = scmp.ne.s32.totalorder %s226_s9, %s1143_s15  ;;  %p1152_p6 = scmp.lt.s32.totalorder %s1143_s15, %s1143_s15 }
  0x26   : > { %p1146_p13 = pnand %p1144_p1, %p1108_p12  ;;  %p1153_p5 = por %p1152_p6, %p1151_p2 }
  0x28   : > { %p1147_p0 = pneg %p1146_p13 }
  0x2a   : > { %p1154_p10 = pnand %p1153_p5, %p1147_p0 }
  0x2c   : > { %1157 = shalt.err (!%p1154_p10)
}
  0x2d   : > { %1011 = dma.hbm_to_vmem [thread:$0]  (!%p1413_p11), %s1584_s4, 256, %s226_s9, [#allocation14], %s1310_s11, %s1310_s11, %s1311_s12  }
  0x2e   : > { %s45_s18 = sadd.s32 1, %s1302_s24  ;;  %s75_s19 = sadd.s32 1, %s1294_s22 }
  0x2f   : > { %p47_p1 = scmp.ge.s32.totalorder %s45_s18, 2  ;;  %p82_p2 = scmp.ne.s32.totalorder %s1294_s22, %s1290_s21 }
  0x30   : > { %p83_p6 = scmp.eq.s32.totalorder %s1306_s25, 0  ;;  %p1025_p12 = scmp.lt.s32.totalorder %s1306_s25, 2 }
  0x31   : > { %s1610_s18 = smov (%p47_p1, %s45_s18), 0  ;;  %p1593_p7 = scmp.eq.s32.totalorder %s1385_s0, 1 }
  0x32   : > { %p84_p3 = por %p83_p6, %p82_p2  ;;  %s70_s30 = ssub.s32 %s1302_s24, %s1610_s18 }
  0x33   : > { %p1445_p9 = por %p1593_p7, %p82_p2  ;;  %s239_s6 = sand.u32 1, %s1294_s22  }
  0x34   : > { %p73_p13 = scmp.eq.s32.totalorder %s70_s30, 0  ;;  %s912_s7 = sshll.u32 %s239_s6, 2 }
  0x35   : > { %s913_s8 = sshll.u32 %s1302_s24, 6  ;;  %s1595_s1 = sld [smem:[#allocation21_spill]] }
  0x36   : > { %s1454_s9 = scalar_select %p73_p13, %s1294_s22, %s75_s19  }
  0x37   : > { %s243_s13 = scalar_lea.vmem [#allocation7], %s912_s7  ;;  %p1461_p11 = pnand %p1025_p12, %p84_p3 }
  0x38   : > { %s251_s14 = sshll.u32 %s243_s13, 4  ;;  %s1597_s2 = sld [smem:[#allocation22_spill]]  ;;  %s252_s14 = int_to_ptr.vmem [resolvable:$true] %s251_s14 }
  0x39   : > { %s240_s19 = scalar_lea.sflag [#allocation8], %s239_s6  ;;  %p1160_p0 = pneg %p1461_p11 }
  0x3a   : > { %s1171_s10 = scalar_lea.vmem %s252_s14, 64  ;;  %s1312_s11 = smov [#allocation7]  }
  0x3b   : > { %s249_s12 = scalar_lea.hbm %s1595_s1, %s913_s8  ;;  %p1172_p5 = scmp.ne.s32.totalorder %s252_s14, %s1171_s10 }
  0x3c   : > { %s1176_s13 = sshll.u32 %s1312_s11, 4  ;;  %s1177_s13 = int_to_ptr.vmem [resolvable:$false] %s1176_s13 }
  0x3d   : > { %p1174_p10 = pnand %p1172_p5, %p1160_p0  ;;  %s1178_s1 = scalar_lea.vmem %s1177_s13, 128 }
  0x3e   : > { %s1468_s30 = scalar_lea.hbm %s1597_s2, %s913_s8  ;;  %p1179_p2 = scmp.lt.s32.totalorder %s252_s14, %s1177_s13 }
  0x3f   : > { %p1175_p1 = pneg %p1174_p10  ;;  %p1180_p6 = scmp.lt.s32.totalorder %s1178_s1, %s1171_s10 }
  0x41   : > { %p1181_p12 = por %p1180_p6, %p1179_p2 }
  0x43   : > { %p1182_p3 = pnand %p1181_p12, %p1175_p1 }
  0x45   : > { %1185 = shalt.err (!%p1182_p3)
}
  0x46   : > { %1015 = dma.hbm_to_vmem [thread:$0]  (!%p1461_p11), %s249_s12, 64, %s252_s14, %s240_s19  }
  0x47   : > { %s258_s6 = sand.u32 1, %s1306_s25   ;;  %s262_s8 = scalar_lea.vmem [#allocation10], %s912_s7 }
  0x48   : > { %s270_s16 = sshll.u32 %s262_s8, 4  ;;  %s259_s17 = scalar_lea.sflag [#allocation11], %s258_s6  ;;  %s271_s16 = int_to_ptr.vmem [resolvable:$true] %s270_s16 }
  0x49   : > { %s1199_s2 = scalar_lea.vmem %s271_s16, 64  ;;  %s1313_s1 = smov [#allocation10]  }
  0x4a   : > { %p1200_p7 = scmp.ne.s32.totalorder %s271_s16, %s1199_s2  ;;  %s1204_s10 = sshll.u32 %s1313_s1, 4  ;;  %s1205_s10 = int_to_ptr.vmem [resolvable:$false] %s1204_s10 }
  0x4b   : > { %s1206_s11 = scalar_lea.vmem %s1205_s10, 128  ;;  %p1207_p10 = scmp.lt.s32.totalorder %s271_s16, %s1205_s10 }
  0x4c   : > { %p1202_p13 = pnand %p1200_p7, %p1160_p0  ;;  %p1208_p1 = scmp.lt.s32.totalorder %s1206_s11, %s1199_s2 }
  0x4e   : > { %p1203_p5 = pneg %p1202_p13  ;;  %p1209_p2 = por %p1208_p1, %p1207_p10 }
  0x50   : > { %p1210_p6 = pnand %p1209_p2, %p1203_p5 }
  0x52   : > { %1213 = shalt.err (!%p1210_p6)
}
  0x53   : > { %1018 = dma.hbm_to_vmem [thread:$0]  (!%p1461_p11), %s1468_s30, 64, %s271_s16, %s259_s17  }
  0x54   : > { %279 = sbr.rel (%p1404_p8) target bundleno = 1213 (0x4bd), region = 40  ;;  %s1487_s7 = sand.u32 (!%p1404_p8), 1, %s1290_s21  }
  0x55   : > { %s917_s12 = sshll.u32 (!%p1404_p8), %s1487_s7, 2  ;;  %s282_s14 = scalar_lea.sflag (!%p1404_p8), [#allocation8], %s1487_s7 }
  0x56   : > { %s285_s19 = scalar_lea.vmem (!%p1404_p8), [#allocation7], %s917_s12 }
  0x59   : > { %1265 = dma.done.wait (%p1394_p4), %s282_s14, 64  }
  0x5a   : > { %1267 = vsyncadd (%p1394_p4), %s282_s14, 4294967232  ;;  %s290_s2 = sand.u32 1, %s1385_s0   ;;  %s294_s29 = scalar_lea.vmem [#allocation10], %s917_s12 }
  0x5b   : > { %s291_s15 = scalar_lea.sflag [#allocation11], %s290_s2 }
  0x5c   : > { %1269 = dma.done.wait (%p1394_p4), %s291_s15, 64  }
  0x5d   : > { %1271 = vsyncadd (%p1394_p4), %s291_s15, 4294967232  ;;  %p1598_p8 = scmp.eq.s32.totalorder %s1385_s0, 0 }
  0x5f   : > { %1273 = dma.done.wait (%p1598_p8), [#allocation11], 256   ;;  %p1599_p11 = pmov %p1598_p8 }
  0x60   : > { %p1600_p0 = pmov %p1598_p8 }
  0x61   : > { %1275 = vsyncadd (%p1599_p11), [#allocation11], 4294967040 }
  0x62   : > { %1277 = dma.done.wait (%p1600_p0), [#allocation14], 256   ;;  %p1601_p12 = pmov %p1600_p0 }
  0x63   : > { %vm356_vm0 = vcmask 261120   ;;  %v1314_v0 = vmov 0.0   ;;  %vm1315_vm1 = vmmov 0   ;;  %v1089_v1 = vld [vmem:[#allocation12 + $0x8] sm:$0xff]   ;;  %v1090_v2 = vld [vmem:[#allocation13 + $0x8] sm:$0xff]   ;;  %v1091_v3 = vld [vmem:[#allocation12] sm:$0xff]  }
  0x64   : > { %1279 = vsyncadd (%p1601_p12), [#allocation14], 4294967040  ;;  %951 = vmatprep.subr.bf16.mxu0 %v1314_v0  ;;  %959 = vmatprep.subr.bf16.mxu1 %v1314_v0  ;;  %408 = vst.msk [vmem:[#allocation5] sm:$0xff] %vm356_vm0, %v1314_v0  ;;  %v1092_v4 = vld [vmem:[#allocation13] sm:$0xff]   ;;  %v410_v6 = vld [vmem:[%s294_s29] sm:$0xf] }
  0x65   : > { %409 = vst.msk [vmem:[#allocation5 + $0x8] sm:$0xff] %vm356_vm0, %v1314_v0  ;;  %955 = vmatprep.mubr.msk.bf16.mxu0 %vm1315_vm1, %v1314_v0  ;;  %963 = vmatprep.mubr.msk.bf16.mxu1 %vm1315_vm1, %v1314_v0  ;;  %v339_v5 = vld [vmem:[%s285_s19] sm:$0xf]  ;;  %vm401_vm2 = vcmask 257024   ;;  %vm473_vm3 = vcmask 130048   ;;  %s1316_s0 = smov 112  }
  0x66   : > { %952 = vmatpush3.bf16.msra.mxu0 %v1089_v1  ;;  %960 = vmatpush3.bf16.msra.mxu1 %v1090_v2  ;;  %vm403_vm4 = vcmask 7168   ;;  %v1317_v23 = vmov -inf   ;;  %vm577_vm5 = vcmask 64512   ;;  %v1318_v34 = vmov 0   ;;  %s1319_s27 = smov 96   ;;  %s742_s30 = sld [smem:[#allocation6]] }
  0x67   : > { %953 = vmatprep.subr.bf16.mxu0 %v1314_v0  ;;  %961 = vmatprep.subr.bf16.mxu1 %v1314_v0  ;;  %405 = vst.msk [vmem:[#allocation3 + $0x8] sm:$0xff] %vm403_vm4, %v1317_v23  ;;  %404 = vst.msk [vmem:[#allocation3] sm:$0xff] %vm403_vm4, %v1317_v23  ;;  %vm606_vm6 = vcmask 1043456   ;;  %s921_s13 = sshll.u32 %s1487_s7, 3  ;;  %s934_s6 = sshll.u32 %s1298_s23, 7 }
  0x68   : > { %406 = vst.msk [vmem:[#allocation4] sm:$0xff] %vm403_vm4, %v1314_v0  ;;  %407 = vst.msk [vmem:[#allocation4 + $0x8] sm:$0xff] %vm403_vm4, %v1314_v0  ;;  %1087 = vset.pattern.permute.xlu0 %v1318_v34  ;;  %1088 = vset.pattern.permute.xlu1 %v1318_v34  ;;  %s333_s8 = scalar_lea.vmem [#allocation15], %s921_s13  ;;  %s778_s10 = scalar_lea.hbm %s1585_s5, %s934_s6 }
  0x69   : > { %s780_s16 = sshll.u32 %s333_s8, 4  ;;  %s766_s11 = scalar_lea.sflag [#allocation9], %s1487_s7  ;;  %s781_s16 = int_to_ptr.vmem [resolvable:$true] %s780_s16 }
  0x6a   : > { %954 = vmatpush3.bf16.msra.mxu0 %v1091_v3  ;;  %962 = vmatpush3.bf16.msra.mxu1 %v1092_v4  ;;  %s1214_s12 = scalar_lea.vmem %s781_s16, 128  ;;  %s1320_s14 = smov [#allocation15]  }
  0x6b   : > { %967 = vmatprep.subr.bf16.mxu0 %v1314_v0  ;;  %973 = vmatprep.subr.bf16.mxu1 %v1314_v0  ;;  %p1215_p4 = scmp.ne.s32.totalorder %s781_s16, %s1214_s12  ;;  %s1218_s23 = sshll.u32 %s1320_s14, 4  ;;  %s1219_s23 = int_to_ptr.vmem [resolvable:$false] %s1218_s23 }
  0x6c   : > { %s1220_s19 = scalar_lea.vmem %s1219_s23, 256  ;;  %p1221_p13 = scmp.lt.s32.totalorder %s781_s16, %s1219_s23 }
  0x6d   : > { %956 = vmatmul.mubr.msk.bf16.vlgmr.msra.gmra.mxu0 %vm356_vm0, %v339_v5  ;;  %964 = vmatmul.mubr.msk.bf16.vlgmr.msra.gmra.mxu1 %vm356_vm0, %v410_v6  ;;  %p1216_p3 = pnand %p1215_p4, %p1445_p9  ;;  %p1222_p5 = scmp.lt.s32.totalorder %s1220_s19, %s1214_s12 }
  0x6e   : > { %969 = vmatprep.mubr.msk.bf16.mxu0 %vm1315_vm1, %v1314_v0  ;;  %975 = vmatprep.mubr.msk.bf16.mxu1 %vm1315_vm1, %v1314_v0  ;;  %v660_v35 = vld [vmem:[#allocation3 + $0x8] sm:$0xff]  ;;  %v574_v38 = vld [vmem:[#allocation3] sm:$0xff] }
  0x6f   : > { %v662_v61 = vld [vmem:[#allocation4 + $0x8] sm:$0xff]  ;;  %p1217_p7 = pneg %p1216_p3  ;;  %p1223_p10 = por %p1222_p5, %p1221_p13 }
  0x71   : > { %p1224_p1 = pnand %p1223_p10, %p1217_p7 }
 0x12d   : > { %v394_v7 = vpop.f32.mrf.mxu0  ;;  %v465_v9 = vpop.f32.mrf.mxu1 }
 0x12e   : > { %v400_v8 = vpack.c.bf16 %v394_v7, %v394_v7  ;;  %v471_v10 = vpack.c.bf16 %v465_v9, %v465_v9  ;;  %v664_v9 = vld [vmem:[#allocation5 + $0x8] sm:$0xff] }
 0x12f   : > { %v957_v11 = vpop.f32.mrf.mxu0  ;;  %v965_v12 = vpop.f32.mrf.mxu1 }
 0x130   : > { %402 = vst.msk [vmem:[#allocation2] sm:$0xf] %vm401_vm2, %v400_v8  ;;  %526 = vrot.lane.b32.xlu0 %v471_v10, %s1316_s0  ;;  %v478_v14 = vsel %vm473_vm3, %v471_v10, 0  ;;  %v576_v12 = vld [vmem:[#allocation5] sm:$0xff] }
 0x131   : > { %v397_v13 = vpop.f32.mrf.mxu0  ;;  %v468_v15 = vpop.f32.mrf.mxu1  ;;  %968 = vmatpush3.bf16.xpose.msra.mxu0 %v478_v14 }
 0x132   : > { %979 = vmatprep.subr.bf16.mxu0 %v1314_v0 }
 0x133   : > { %v958_v16 = vpop.f32.mrf.mxu0  ;;  %v966_v17 = vpop.f32.mrf.mxu1 }
 0x137   : > { %v472_v18 = vld [vmem:[#allocation2] sm:$0xf] }
 0x138   : > { %v929_v19 = vcombine.low %v472_v18, %v472_v18  ;;  %970 = vmatmul.mubr.msk.bf16.vlgmr.msra.gmra.mxu0 %vm473_vm3, %v472_v18 }
 0x139   : > { %981 = vmatprep.mubr.msk.bf16.mxu0 %vm1315_vm1, %v1314_v0 }
 0x13a   : > { %523 = vrot.lane.b32.xlu0 %v929_v19, %s1316_s0 }
 0x1a2   : > { %v527_v20 = vpop.permute.xlu0 %526 }
 0x1a3   : > { %v532_v21 = vsel %vm473_vm3, %v527_v20, 0 }
 0x1a4   : > { %974 = vmatpush3.bf16.xpose.msra.mxu1 %v532_v21 }
 0x1a5   : > { %985 = vmatprep.subr.bf16.mxu1 %v1314_v0 }
 0x1ac   : > { %v524_v22 = vpop.permute.xlu0 %523 }
 0x1ad   : > { %976 = vmatmul.mubr.msk.bf16.vlgmr.msra.gmra.mxu1 %vm473_vm3, %v524_v22 }
 0x1ae   : > { %987 = vmatprep.mubr.msk.bf16.mxu1 %vm1315_vm1, %v1314_v0  ;;  %v575_v0 = vld [vmem:[#allocation4] sm:$0xff] }
 0x1f8   : > { %v514_v24 = vpop.f32.mrf.mxu0 }
 0x1f9   : > { %v578_v32 = vsel %vm577_vm5, %v514_v24, -inf }
 0x1fa   : > { %v971_v25 = vpop.f32.mrf.mxu0 }
 0x1fc   : > { %v517_v26 = vpop.f32.mrf.mxu0 }
 0x1fe   : > { %v972_v27 = vpop.f32.mrf.mxu0 }
 0x26d   : > { %v568_v28 = vpop.f32.mrf.mxu1 }
 0x26e   : > { %v665_v29 = vsel %vm577_vm5, %v568_v28, -inf }
 0x26f   : > { %666 = vmax.xlane.f32.xlu1 %v665_v29  ;;  %v977_v30 = vpop.f32.mrf.mxu1 }
 0x271   : > { %v571_v31 = vpop.f32.mrf.mxu1 }
 0x273   : > { %v978_v33 = vpop.f32.mrf.mxu1  ;;  %579 = vmax.xlane.f32.xlu1 %v578_v32 }
 0x2f8   : > { %v667_v36 = vpop.xlane.xlu1 %666 }
 0x2f9   : > { %v668_v37 = vmax.f32 %v660_v35, %v667_v36 }
 0x2fb   : > { %v669_v39 = vsub.f32 %v660_v35, %v668_v37  ;;  %738 = vst.msk [vmem:[#allocation3 + $0x8] sm:$0xff] %vm403_vm4, %v668_v37  ;;  %674 = vperm.xlu0 %1087, %v668_v37  }
 0x2fc   : > { %v580_v40 = vpop.xlane.xlu1 %579 }
 0x2fd   : > { %v581_v41 = vmax.f32 %v574_v38, %v580_v40  ;;  %v670_v55 = vmul.f32 1.442695, %v669_v39 }
 0x2ff   : > { %v582_v42 = vsub.f32 %v574_v38, %v581_v41  ;;  %658 = vst.msk [vmem:[#allocation3] sm:$0xff] %vm403_vm4, %v581_v41  ;;  %601 = vrot.lane.b32.xlu0 %v471_v10, %s1319_s27  ;;  %587 = vperm.xlu1 %1088, %v581_v41  }
 0x301   : > { %v583_v58 = vmul.f32 1.442695, %v582_v42 }
 0x376   : > { %v675_v43 = vpop.permute.xlu0 %674 }
 0x377   : > { %v677_v44 = vsub.f32 %v568_v28, %v675_v43  ;;  %v761_v28 = vstv %s742_s30 }
 0x379   : > { %v678_v45 = vmul.f32 1.442695, %v677_v44 }
 0x37a   : > { %v602_v46 = vpop.permute.xlu0 %601  ;;  %v588_v47 = vpop.permute.xlu1 %587 }
 0x37b   : > { %1094 = vpow2.f32 %v678_v45  ;;  %v608_v48 = vsel %vm606_vm6, %v602_v46, 0  ;;  %v590_v49 = vsub.f32 %v514_v24, %v588_v47 }
 0x37c   : > { %980 = vmatpush3.bf16.msra.mxu0 %v608_v48  ;;  %986 = vmatpush3.bf16.msra.mxu1 %v608_v48 }
 0x37d   : > { %v591_v50 = vmul.f32 1.442695, %v590_v49 }
 0x37f   : > { %1096 = vpow2.f32 %v591_v50 }
 0x380   : > { %1098 = vpow2.f32 %v670_v55 }
 0x381   : > { %1100 = vpow2.f32 %v583_v58 }
 0x388   : > { %v1095_v51 = vpop.eup %1094 }
 0x389   : > { %v681_v52 = vsel %vm577_vm5, %v1095_v51, 0.0  ;;  %v686_v53 = vpack.c.bf16 %v1095_v51, %v1095_v51 }
 0x38a   : > { %682 = vadd.xlane.f32.xlu0 %v681_v52 }
 0x38b   : > { %988 = vmatmul.mubr.msk.bf16.vlgmr.msra.gmra.mxu1 %vm577_vm5, %v686_v53 }
 0x38c   : > { %v1097_v54 = vpop.eup %1096 }
 0x38d   : > { %v594_v56 = vsel %vm577_vm5, %v1097_v54, 0.0  ;;  %v600_v57 = vpack.c.bf16 %v1097_v54, %v1097_v54  ;;  %v1099_v59 = vpop.eup %1098 }
 0x38e   : > { %595 = vadd.xlane.f32.xlu1 %v594_v56  ;;  %v1101_v60 = vpop.eup %1100  ;;  %v680_v62 = vmul.f32 %v1099_v59, %v662_v61 }
 0x38f   : > { %982 = vmatmul.mubr.msk.bf16.vlgmr.msra.gmra.mxu0 %vm577_vm5, %v600_v57  ;;  %v593_v2 = vmul.f32 %v1101_v60, %v575_v0 }
 0x39f   : > { %732 = vperm.xlu1 %1088, %v1099_v59  }
 0x3a0   : > { %652 = vperm.xlu0 %1087, %v1101_v60  }
 0x413   : > { %v683_v63 = vpop.xlane.xlu0 %682 }
 0x414   : > { %v684_v1 = vadd.f32 %v683_v63, %v680_v62 }
 0x416   : > { %685 = vst.msk [vmem:[#allocation4 + $0x8] sm:$0xff] %vm403_vm4, %v684_v1 }
 0x417   : > { %v596_v3 = vpop.xlane.xlu1 %595 }
 0x418   : > { %v597_v4 = vadd.f32 %v596_v3, %v593_v2 }
 0x41a   : > { %599 = vst.msk [vmem:[#allocation4] sm:$0xff] %vm403_vm4, %v597_v4 }
 0x41b   : > { %v733_v10 = vpop.permute.xlu1 %732  ;;  %v653_v13 = vpop.permute.xlu0 %652 }
 0x41c   : > { %v735_v11 = vmul.f32 %v733_v10, %v664_v9  ;;  %v655_v17 = vmul.f32 %v653_v13, %v576_v12 }
 0x41d   : > { %v745_v5 = vld [vmem:[#allocation4 + $0x8] sm:$0xff] }
 0x41e   : > { %1102 = vrcp.f32 %v745_v5 }
 0x421   : > { %v743_v6 = vld [vmem:[#allocation4] sm:$0xff] }
 0x422   : > { %1104 = vrcp.f32 %v743_v6 }
 0x42b   : > { %v1103_v7 = vpop.eup %1102 }
 0x42c   : > { %757 = vperm.xlu0 %1087, %v1103_v7  }
 0x42f   : > { %v1105_v8 = vpop.eup %1104 }
 0x430   : > { %750 = vperm.xlu0 %1087, %v1105_v8  }
 0x44b   : > { %v724_v14 = vpop.f32.mrf.mxu1 }
 0x44c   : > { %v736_v15 = vadd.f32 %v735_v11, %v724_v14 }
 0x44d   : > { %v989_v16 = vpop.f32.mrf.mxu1 }
 0x44e   : > { %737 = vst.msk [vmem:[#allocation5 + $0x8] sm:$0xff] %vm356_vm0, %v736_v15 }
 0x44f   : > { %v644_v18 = vpop.f32.mrf.mxu0  ;;  %v727_v19 = vpop.f32.mrf.mxu1 }
 0x450   : > { %v656_v20 = vadd.f32 %v655_v17, %v644_v18 }
 0x451   : > { %v983_v21 = vpop.f32.mrf.mxu0  ;;  %v990_v22 = vpop.f32.mrf.mxu1 }
 0x452   : > { %657 = vst.msk [vmem:[#allocation5] sm:$0xff] %vm356_vm0, %v656_v20 }
 0x453   : > { %v647_v23 = vpop.f32.mrf.mxu0 }
 0x455   : > { %v984_v24 = vpop.f32.mrf.mxu0  ;;  %v754_v25 = vld [vmem:[#allocation5 + $0x8] sm:$0xff] }
 0x459   : > { %v747_v30 = vld [vmem:[#allocation5] sm:$0xff] }
 0x4a7   : > { %v758_v26 = vpop.permute.xlu0 %757 }
 0x4a8   : > { %v760_v27 = vmul.f32 %v758_v26, %v754_v25 }
 0x4aa   : > { %v762_v31 = vmul.f32 %v761_v28, %v760_v27 }
 0x4ab   : > { %v751_v29 = vpop.permute.xlu0 %750 }
 0x4ac   : > { %v753_v32 = vmul.f32 %v751_v29, %v747_v30 }
 0x4ae   : > { %v763_v33 = vsub.f32 %v753_v32, %v762_v31 }
 0x4b0   : > { %764 = vst.msk [vmem:[%s333_s8] sm:$0xff] %vm356_vm0, %v763_v33 }
 0x4b1   : > { %1227 = shalt.err (!%p1224_p1)
}
 0x4b2   : > { %s1228_s2 = scalar_lea.hbm %s778_s10, 128  ;;  %s1232_s29 = scalar_lea.hbm %s1585_s5, 256 }
 0x4b3   : > { %p1229_p2 = scmp.ne.s32.totalorder %s778_s10, %s1228_s2  ;;  %p1233_p11 = scmp.lt.s32.totalorder %s778_s10, %s1585_s5 }
 0x4b4   : > { %p1234_p0 = scmp.lt.s32.totalorder %s1232_s29, %s1228_s2 }
 0x4b5   : > { %p1230_p6 = pnand %p1229_p2, %p1445_p9 }
 0x4b6   : > { %p1235_p12 = por %p1234_p0, %p1233_p11 }
 0x4b7   : > { %p1231_p8 = pneg %p1230_p6 }
 0x4b9   : > { %p1236_p4 = pnand %p1235_p12, %p1231_p8 }
 0x4bb   : > { %1239 = shalt.err (!%p1236_p4)
}
 0x4bc   : > { %1003 = dma.vmem_to_hbm [thread:$0]  (%p1445_p9), %s781_s16, 128, %s778_s10, %s766_s11  }
 0x4bd PF: > { %s792_s30 = sand.u32 1, %s1286_s20   ;;  %p1602_p3 = scmp.ne.s32.totalorder %s1590_s28, 0 }
 0x4be   : > { %p1603_p7 = scmp.ge.s32.totalorder %s1306_s25, 2  ;;  %s793_s13 = scalar_lea.sflag [#allocation9], %s792_s30 }
 0x4c0   : > { %p1020_p13 = pnand %p1603_p7, %p1602_p3 }
 0x4c2   : > { %p1021_p5 = pneg %p1020_p13 }
 0x4c4   : > { %1281 = dma.done.wait (%p1021_p5), %s793_s13, 128  }
 0x4c5   : > { %1283 = vsyncadd (%p1021_p5), %s793_s13, 4294967168  ;;  %s26_s25 = sadd.s32 1, %s1306_s25   ;;  %s1604_s20 = smov %s1290_s21 }
 0x4c6   : > { %p23_p10 = scmp.ge.s32.totalorder %s26_s25, 4   ;;  %s1605_s21 = smov %s1294_s22 }
 0x4c7   : > { %s1606_s22 = smov %s1454_s9  ;;  %s1607_s23 = smov %s1302_s24 }
 0x4c8   : > { %s1608_s24 = smov %s1610_s18  ;;  %25 = sbr.rel (!%p23_p10) target bundleno = 13 (0xd), region = 117 }
 0x4cd   :  { %798 = vsyncpa [#allocation8], 1 }
 0x4ce   :  { %800 = vsyncpa [#allocation8 + $0x1], 1 }
 0x4cf   :  { %801 = vsyncpa [#allocation11], 1 }
 0x4d0   :  { %803 = vsyncpa [#allocation11 + $0x1], 1 }
 0x4d1   :  { %804 = vsyncpa [#allocation14], 1 }
 0x4d2   :  { %805 = vsyncpa [#allocation9], 1 }
 0x4d3   :  { %807 = vsyncpa [#allocation9 + $0x1], 1 }

</bundles_post_ra>
